<compile_context>
chip_gen: v7x
topology: tpu7x:2x2x1
jax: 0.10.0
libtpu: 0.0.40
codegen_flags: <defaults>
</compile_context>

<pallas_src>
import math
import jax
import jax.numpy as jnp
from jax.experimental import pallas as pl
from jax.experimental.pallas import tpu as pltpu


# ---------------- model hyper-params (small, consistent with the module) ----
BATCH = 2
SEQ = 8
D_IN = 32        # input_dim
D_HID = 64       # hidden_size
D_OUT = 32       # output_dim


def gate_mlp_kernel(x_ref, w1_ref, b1_ref, w2_ref, b2_ref, o_ref):
    """Fused Linear -> ReLU -> Linear -> Sigmoid on one row-tile.

    x_ref  : (TN, D_IN)     rows of hidden_states (batch*seq folded)
    w1_ref : (D_IN, D_HID)  pre-transposed weight of Linear1 (in, out)
    b1_ref : (1, D_HID)
    w2_ref : (D_HID, D_OUT) pre-transposed weight of Linear2 (in, out)
    b2_ref : (1, D_OUT)
    o_ref  : (TN, D_OUT)
    """
    # Dropout(p) in eval mode == identity.
    x = x_ref[...]

    # Linear1 + ReLU (MXU matmul, f32 accumulate; bias broadcast on VPU).
    h = jnp.dot(x, w1_ref[...], preferred_element_type=jnp.float32) + b1_ref[...]
    h = jnp.maximum(h, 0.0)

    # Linear2 + Sigmoid (exp runs on the EUP slot).
    z = jnp.dot(h, w2_ref[...], preferred_element_type=jnp.float32) + b2_ref[...]
    o_ref[...] = jax.nn.sigmoid(z)


def gate_mlp(hidden_states, W1, b1, W2, b2, *, row_tile=None):
    """Pallas wrapper.  Weights are given in PyTorch nn.Linear convention
    (out, in); they are transposed once here on the host."""
    d_in = W1.shape[1]
    d_hid = W1.shape[0]
    d_out = W2.shape[0]

    # Fold all leading dims into one row axis.
    lead = hidden_states.shape[:-1]
    x2 = hidden_states.reshape(-1, d_in)
    n_rows = x2.shape[0]

    # Host-side prep: (in, out) weights, 2-D biases -> no in-kernel transposes.
    w1t = jnp.asarray(W1).T            # (D_IN, D_HID)
    w2t = jnp.asarray(W2).T            # (D_HID, D_OUT)
    b1r = jnp.asarray(b1).reshape(1, d_hid)
    b2r = jnp.asarray(b2).reshape(1, d_out)

    # Single grid step at small sizes (row_tile == n_rows); tileable if n_rows grows.
    if row_tile is None:
        row_tile = n_rows
    assert n_rows % row_tile == 0
    grid = (n_rows // row_tile,)

    out = pl.pallas_call(
        gate_mlp_kernel,
        out_shape=jax.ShapeDtypeStruct((n_rows, d_out), jnp.float32),
        grid=grid,
        in_specs=[
            pl.BlockSpec((row_tile, d_in), lambda i: (i, 0)),   # x rows
            pl.BlockSpec((d_in, d_hid), lambda i: (0, 0)),      # W1^T (resident)
            pl.BlockSpec((1, d_hid), lambda i: (0, 0)),         # b1
            pl.BlockSpec((d_hid, d_out), lambda i: (0, 0)),     # W2^T (resident)
            pl.BlockSpec((1, d_out), lambda i: (0, 0)),         # b2
        ],
        out_specs=pl.BlockSpec((row_tile, d_out), lambda i: (i, 0)),
        compiler_params=pltpu.CompilerParams(
            dimension_semantics=("parallel",)),
    )(x2, w1t, b1r, w2t, b2r)

    return out.reshape(*lead, d_out)


def gate_mlp_ref(hidden_states, W1, b1, W2, b2):
    """Pure-JAX reference mirroring the PyTorch forward (eval mode)."""
    h = hidden_states @ W1.T + b1
    h = jnp.maximum(h, 0.0)
    z = h @ W2.T + b2
    return jax.nn.sigmoid(z)


if __name__ == "__main__":
    key0 = jax.random.PRNGKey(0)
    ks = jax.random.split(key0, 5)

    hidden_states = jax.random.normal(ks[0], (BATCH, SEQ, D_IN), jnp.float32)

    # Deterministic parameter init: xavier_normal_ weights (as in _initialize),
    # nn.Linear-default uniform biases.
    def xavier_normal(k, out_dim, in_dim):
        std = math.sqrt(2.0 / (in_dim + out_dim))
        return std * jax.random.normal(k, (out_dim, in_dim), jnp.float32)

    def bias_init(k, out_dim, in_dim):
        bound = 1.0 / math.sqrt(in_dim)
        return jax.random.uniform(k, (out_dim,), jnp.float32, -bound, bound)

    W1 = xavier_normal(ks[1], D_HID, D_IN)
    b1 = bias_init(ks[2], D_HID, D_IN)
    W2 = xavier_normal(ks[3], D_OUT, D_HID)
    b2 = bias_init(ks[4], D_OUT, D_HID)

    out = gate_mlp(hidden_states, W1, b1, W2, b2)
    out = jax.block_until_ready(out)

    ref = gate_mlp_ref(hidden_states, W1, b1, W2, b2)
    assert out.shape == (BATCH, SEQ, D_OUT)
    assert jnp.allclose(out, ref, atol=1e-5, rtol=1e-5), "mismatch vs reference"

    print("KERNEL_OK")
</pallas_src>

<mosaic_0001>
module attributes {stable_mosaic.version = 11 : i64} {
  func.func @gate_mlp_kernel(%arg0: i32, %arg1: memref<16x32xf32, #tpu.memory_space<vmem>>, %arg2: memref<32x64xf32, #tpu.memory_space<vmem>>, %arg3: memref<1x64xf32, #tpu.memory_space<vmem>>, %arg4: memref<64x32xf32, #tpu.memory_space<vmem>>, %arg5: memref<1x32xf32, #tpu.memory_space<vmem>>, %arg6: memref<16x32xf32, #tpu.memory_space<vmem>>) attributes {dimension_semantics = [#tpu.dimension_semantics<parallel>], iteration_bounds = array<i64: 1>, scalar_prefetch = 0 : i64, scratch_operands = 0 : i64, tpu.core_type = #tpu.core_type<tc>, window_params = [{transform_indices = @transform_0, window_bounds = array<i64: 16, 32>}, {pipeline_mode = #tpu.pipeline_mode<synchronous>, transform_indices = @transform_1, window_bounds = array<i64: 32, 64>}, {pipeline_mode = #tpu.pipeline_mode<synchronous>, transform_indices = @transform_2, window_bounds = array<i64: 1, 64>}, {pipeline_mode = #tpu.pipeline_mode<synchronous>, transform_indices = @transform_3, window_bounds = array<i64: 64, 32>}, {pipeline_mode = #tpu.pipeline_mode<synchronous>, transform_indices = @transform_4, window_bounds = array<i64: 1, 32>}, {transform_indices = @transform_5, window_bounds = array<i64: 16, 32>}]} {
    %c0 = arith.constant 0 : index
    %c0_0 = arith.constant 0 : index
    %0 = vector.load %arg1[%c0, %c0_0] : memref<16x32xf32, #tpu.memory_space<vmem>>, vector<16x32xf32>
    %c0_1 = arith.constant 0 : index
    %c0_2 = arith.constant 0 : index
    %1 = vector.load %arg2[%c0_1, %c0_2] : memref<32x64xf32, #tpu.memory_space<vmem>>, vector<32x64xf32>
    %cst = arith.constant dense<0.000000e+00> : vector<16x64xf32>
    %2 = tpu.matmul %0, %1, %cst {dimension_numbers = #tpu.dot_dimension_numbers<[1], [0], [0], [1], [0, 0, 1, 1], [], []>} : vector<16x32xf32>, vector<32x64xf32>, vector<16x64xf32> -> vector<16x64xf32>
    %c0_3 = arith.constant 0 : index
    %c0_4 = arith.constant 0 : index
    %3 = vector.load %arg3[%c0_3, %c0_4] : memref<1x64xf32, #tpu.memory_space<vmem>>, vector<1x64xf32>
    %4 = vector.broadcast %3 : vector<1x64xf32> to vector<16x64xf32>
    %5 = arith.addf %2, %4 : vector<16x64xf32>
    %cst_5 = arith.constant 0.000000e+00 : f32
    %6 = vector.broadcast %cst_5 : f32 to vector<16x64xf32>
    %7 = arith.maximumf %5, %6 : vector<16x64xf32>
    %c0_6 = arith.constant 0 : index
    %c0_7 = arith.constant 0 : index
    %8 = vector.load %arg4[%c0_6, %c0_7] : memref<64x32xf32, #tpu.memory_space<vmem>>, vector<64x32xf32>
    %cst_8 = arith.constant dense<0.000000e+00> : vector<16x32xf32>
    %9 = tpu.matmul %7, %8, %cst_8 {dimension_numbers = #tpu.dot_dimension_numbers<[1], [0], [0], [1], [0, 0, 1, 1], [], []>} : vector<16x64xf32>, vector<64x32xf32>, vector<16x32xf32> -> vector<16x32xf32>
    %c0_9 = arith.constant 0 : index
    %c0_10 = arith.constant 0 : index
    %10 = vector.load %arg5[%c0_9, %c0_10] : memref<1x32xf32, #tpu.memory_space<vmem>>, vector<1x32xf32>
    %11 = vector.broadcast %10 : vector<1x32xf32> to vector<16x32xf32>
    %12 = arith.addf %9, %11 : vector<16x32xf32>
    %13 = arith.negf %12 : vector<16x32xf32>
    %14 = math.exp %13 : vector<16x32xf32>
    %cst_11 = arith.constant 1.000000e+00 : f32
    %15 = vector.broadcast %cst_11 : f32 to vector<16x32xf32>
    %16 = arith.addf %15, %14 : vector<16x32xf32>
    %17 = arith.divf %15, %16 : vector<16x32xf32>
    %c0_12 = arith.constant 0 : index
    %c0_13 = arith.constant 0 : index
    %18 = vector.load %arg6[%c0_12, %c0_13] : memref<16x32xf32, #tpu.memory_space<vmem>>, vector<16x32xf32>
    tpu.vector_store %arg6[%c0_12, %c0_13], %17 {strides = array<i32>} : memref<16x32xf32, #tpu.memory_space<vmem>>, vector<16x32xf32>,
    return
  }
  func.func @transform_0(%arg0: i32) -> (i32, i32) {
    %c0_i32 = arith.constant 0 : i32
    %c0_i32_0 = arith.constant 0 : i32
    return %arg0, %c0_i32 : i32, i32
  }
  func.func @transform_1(%arg0: i32) -> (i32, i32) {
    %c0_i32 = arith.constant 0 : i32
    %c0_i32_0 = arith.constant 0 : i32
    %c0_i32_1 = arith.constant 0 : i32
    return %c0_i32, %c0_i32_0 : i32, i32
  }
  func.func @transform_2(%arg0: i32) -> (i32, i32) {
    %c0_i32 = arith.constant 0 : i32
    %c0_i32_0 = arith.constant 0 : i32
    %c0_i32_1 = arith.constant 0 : i32
    return %c0_i32, %c0_i32_0 : i32, i32
  }
  func.func @transform_3(%arg0: i32) -> (i32, i32) {
    %c0_i32 = arith.constant 0 : i32
    %c0_i32_0 = arith.constant 0 : i32
    %c0_i32_1 = arith.constant 0 : i32
    return %c0_i32, %c0_i32_0 : i32, i32
  }
  func.func @transform_4(%arg0: i32) -> (i32, i32) {
    %c0_i32 = arith.constant 0 : i32
    %c0_i32_0 = arith.constant 0 : i32
    %c0_i32_1 = arith.constant 0 : i32
    return %c0_i32, %c0_i32_0 : i32, i32
  }
  func.func @transform_5(%arg0: i32) -> (i32, i32) {
    %c0_i32 = arith.constant 0 : i32
    %c0_i32_0 = arith.constant 0 : i32
    return %arg0, %c0_i32 : i32, i32
  }
}

</mosaic_0001>

<bundles_post_ra>
// kernel: tpu_custom_call.1
= control target key start
LH: loop header
LB: loop body
LE: loop exit
PB: predicated region body
PF: predicated region fallthrough
CT: control target
= control target key end

     0   :  { %vm34_vm0 = vcmask 261120   ;;  %s455_s0 = inlined_call_operand.vmem [shape: f32[16,32], index: 0, kind: input, shape index: {}]   ;;  %s456_s1 = inlined_call_operand.vmem [shape: f32[32,64], index: 1, kind: input, shape index: {}]   ;;  %s457_s2 = inlined_call_operand.vmem [shape: f32[1,64], index: 2, kind: input, shape index: {}]   ;;  %s458_s3 = inlined_call_operand.vmem [shape: f32[64,32], index: 3, kind: input, shape index: {}]   ;;  %s459_s4 = inlined_call_operand.vmem [shape: f32[1,32], index: 4, kind: input, shape index: {}]   ;;  %s460_s5 = inlined_call_operand.hbm [shape: f32[16,32], index: 5, kind: output, shape index: {}]  }
   0x1   :  { %v23_v0 = vld [vmem:[%s456_s1] sm:$0xff]  ;;  %v24_v1 = vld [vmem:[%s456_s1 + $0x8] sm:$0xff]  ;;  %v25_v2 = vld [vmem:[%s456_s1 + $0x10] sm:$0xff] }
   0x2   :  { %v299_v3 = vpack.c.bf16 %v24_v1, %v23_v0  ;;  %v26_v4 = vld [vmem:[%s456_s1 + $0x18] sm:$0xff]  ;;  %v21_v5 = vld [vmem:[%s455_s0] sm:$0xff]  ;;  %v119_v8 = vld [vmem:[%s458_s3 + $0x8] sm:$0xff] }
   0x3   :  { %v303_v6 = vpack.c.bf16 %v26_v4, %v25_v2  ;;  %277 = vmatprep.mubr.msk.f32.mxu0 %vm34_vm0, %v21_v5  ;;  %v118_v7 = vld [vmem:[%s458_s3] sm:$0xff]  ;;  %v120_v9 = vld [vmem:[%s458_s3 + $0x10] sm:$0xff]  ;;  %v121_v11 = vld [vmem:[%s458_s3 + $0x18] sm:$0xff] }
   0x4   :  { %300 = vmatprep.subr.bf16.mxu0 %v299_v3  ;;  %v307_v10 = vpack.c.bf16 %v119_v8, %v118_v7  ;;  %v311_v12 = vpack.c.bf16 %v121_v11, %v120_v9  ;;  %v122_v13 = vld [vmem:[%s458_s3 + $0x20] sm:$0xff]  ;;  %v123_v14 = vld [vmem:[%s458_s3 + $0x28] sm:$0xff] }
   0x5   :  { %302 = vmatpush3.bf16.msra.mxu0 %v299_v3 }
   0x6   :  { %10 = vsyncpa [#allocation3], 0  ;;  %304 = vmatprep.subr.bf16.mxu0 %v303_v6  ;;  %308 = vmatprep.subr.bf16.mxu1 %v307_v10  ;;  %v315_v15 = vpack.c.bf16 %v123_v14, %v122_v13  ;;  %v22_v16 = vld [vmem:[%s455_s0 + $0x8] sm:$0xff]  ;;  %v124_v17 = vld [vmem:[%s458_s3 + $0x30] sm:$0xff]  ;;  %vm133_vm1 = vcmask 523264  }
   0x7   :  { %310 = vmatpush3.bf16.msra.mxu1 %v307_v10  ;;  %v125_v18 = vld [vmem:[%s458_s3 + $0x38] sm:$0xff]  ;;  %v245_v20 = vld [vmem:[%s457_s2] ss:$0 sm:$0xff]  ;;  %s358_s2 = smov [#allocation2]  }
   0x8   :  { %312 = vmatprep.subr.bf16.mxu1 %v311_v12  ;;  %v319_v19 = vpack.c.bf16 %v125_v18, %v124_v17  ;;  %v248_v27 = vld [vmem:[%s459_s4] ss:$0 sm:$0xff]  ;;  %s234_s3 = sshll.u32 %s358_s2, 4  ;;  %s235_s3 = int_to_ptr.vmem [resolvable:$true] %s234_s3 }
   0x9   :  { %306 = vmatpush3.bf16.msra.mxu0 %v303_v6  ;;  %s334_s4 = scalar_lea.vmem %s235_s3, 256  ;;  %p339_p1 = scmp.lt.s32.totalorder %s235_s3, %s235_s3 }
   0xa   :  { %p335_p0 = scmp.ne.s32.totalorder %s235_s3, %s334_s4  ;;  %p340_p2 = scmp.lt.s32.totalorder %s334_s4, %s334_s4 }
   0xb   :  { %314 = vmatpush3.bf16.msra.mxu1 %v311_v12 }
   0xc   :  { %278 = vmatmul.mubr.msk.f32.vlgmr.msra.gmra.mrb[0].mxu0 %vm34_vm0, %v22_v16  ;;  %316 = vmatprep.subr.bf16.mxu1 %v315_v15  ;;  %p341_p3 = por %p340_p2, %p339_p1 }
   0xe   :  { %p342_p4 = pnand %p341_p3, %p335_p0 }
   0xf   :  { %318 = vmatpush3.bf16.msra.mxu1 %v315_v15 }
  0x10   :  { %320 = vmatprep.subr.bf16.mxu1 %v319_v19 }
  0x13   :  { %322 = vmatpush3.bf16.msra.mxu1 %v319_v19 }
  0xdf   :  { %v279_v21 = vpop.f32.mrb[0].mxu0 }
  0xe0   :  { %v113_v22 = vadd.f32 %v279_v21, %v245_v20  ;;  %v107_v23 = vpop.f32.mrb[1].mxu0 }
  0xe1   :  { %v108_v24 = vadd.f32 %v245_v20, %v107_v23 }
  0xe2   :  { %v117_v26 = vmax.f32 %v113_v22, 0.0 }
  0xe3   :  { %v116_v25 = vmax.f32 %v108_v24, 0.0 }
  0xe5   :  { %296 = vmatprep.mubr.msk.f32.mxu1 %vm133_vm1, %v116_v25 }
  0xe6   :  { %297 = vmatmul.mubr.msk.f32.vlgmr.msra.gmra.mrb[0].mxu1 %vm133_vm1, %v117_v26 }
 0x1b9   :  { %v298_v28 = vpop.f32.mrb[0].mxu1 }
 0x1ba   :  { %v212_v29 = vadd.f32 %v298_v28, %v248_v27  ;;  %v206_v30 = vpop.f32.mrb[1].mxu1 }
 0x1bb   :  { %v207_v31 = vadd.f32 %v248_v27, %v206_v30 }
 0x1bc   :  { %v252_v32 = vmul.f32 -1.442695, %v212_v29 }
 0x1bd   :  { %v251_v33 = vmul.f32 -1.442695, %v207_v31 }
 0x1be   :  { %326 = vpow2.f32 %v252_v32 }
 0x1bf   :  { %328 = vpow2.f32 %v251_v33 }
 0x1c8   :  { %v327_v34 = vpop.eup %326 }
 0x1c9   :  { %v329_v35 = vpop.eup %328  ;;  %v222_v36 = vadd.f32 1.0, %v327_v34 }
 0x1ca   :  { %v221_v37 = vadd.f32 1.0, %v329_v35 }
 0x1cb   :  { %330 = vrcp.f32 %v222_v36 }
 0x1cc   :  { %332 = vrcp.f32 %v221_v37 }
 0x1d5   :  { %v331_v38 = vpop.eup %330 }
 0x1d6   :  { %v333_v39 = vpop.eup %332  ;;  %228 = vst.msk [vmem:[#allocation2 + $0x8] sm:$0xff] %vm34_vm0, %v331_v38 }
 0x1d7   :  { %227 = vst.msk [vmem:[#allocation2] sm:$0xff] %vm34_vm0, %v333_v39 }
 0x1d8   :  { %345 = shalt.err (!%p342_p4)
}
 0x1d9   :  { %s346_s25 = scalar_lea.hbm %s460_s5, 256 }
 0x1da   :  { %p347_p5 = scmp.ne.s32.totalorder %s460_s5, %s346_s25  ;;  %p350_p6 = scmp.lt.u32.totalorder %s346_s25, %s460_s5 }
 0x1dc   :  { %p352_p7 = pnand %p350_p6, %p347_p5 }
 0x1de   :  { %355 = shalt.err (!%p352_p7)
}
 0x1df   :  { %s359_s30 = smov 128   ;;  %s360_s6 = smov 8  }
 0x1e0   :  { %240 = dma.vmem_to_hbm [thread:$0]  %s235_s3, 256, %s460_s5, [#allocation3], %s359_s30, %s359_s30, %s360_s6  }
 0x1e1   :  { %356 = dma.done.wait [#allocation3], 256  }
 0x1e2   :  { %357 = vsyncadd [#allocation3], 4294967040 }
 0x1e3   :  { %244 = vsyncpa [#allocation3], 1 }

</bundles_post_ra>
